<compile_context>
chip_gen: v6e
topology: v6e:2x2x1
jax: 0.10.0
libtpu: 0.0.40
codegen_flags: <defaults>
</compile_context>

<pallas_src>
import functools

import jax
import jax.numpy as jnp
from jax import lax
from jax.experimental import pallas as pl
from jax.experimental.pallas import tpu as pltpu

_LANES = 1024        # lane-dense width (multiple of 128)
_BLOCK_ROWS = 512    # up to (512, 1024) f32 block = 2 MiB per buffer


# ---------------------------------------------------------------------------
# Kernel: uniform quantize / dequantize (elementwise hot path)
# ---------------------------------------------------------------------------
def _quant_kernel(params_ref, seed_ref, x_ref, o_ref, *,
                  qmax, min_value, stochastic, lanes, block_rows):
    step = params_ref[0]        # quantization step  (max_value - min_value) / qmax
    inv_step = params_ref[1]    # its reciprocal (precomputed; no per-element divide)

    out = (x_ref[...].astype(jnp.float32) - min_value) * inv_step   # qmin == 0

    if stochastic > 0.0:
        # --- portable counter-based PRNG (murmur3 fmix32 on global element idx) ---
        shape = out.shape
        base = (seed_ref[0] * jnp.int32(-1640531535)                  # seed * 0x9E3779B1
                + pl.program_id(0) * jnp.int32(block_rows * lanes))   # block offset
        r = lax.broadcasted_iota(jnp.int32, shape, 0)
        c = lax.broadcasted_iota(jnp.int32, shape, 1)
        h = base + r * jnp.int32(lanes) + c                           # unique per element
        # fmix32 in int32 two's-complement (logical shifts via shift+mask)
        h = h ^ ((h >> 16) & jnp.int32(0x0000FFFF))
        h = h * jnp.int32(-2048144789)                                # 0x85EBCA6B
        h = h ^ ((h >> 13) & jnp.int32(0x0007FFFF))
        h = h * jnp.int32(-1028477387)                                # 0xC2B2AE35
        h = h ^ ((h >> 16) & jnp.int32(0x0000FFFF))
        # exponent-bit trick: 23 mantissa bits -> float in [1, 2) -> [0, 1)
        mant = (h >> 9) & jnp.int32(0x007FFFFF)
        u01 = lax.bitcast_convert_type(mant | jnp.int32(0x3F800000),
                                       jnp.float32) - 1.0
        out = out + (u01 * 2.0 - 1.0) * stochastic                    # U(-stoch, stoch)

    out = jnp.round(jnp.clip(out, 0.0, qmax))      # round-half-to-even == torch.round_
    o_ref[...] = (out * step + min_value).astype(o_ref.dtype)


# ---------------------------------------------------------------------------
# Wrapper: QuantMeasure.forward(input, i) with calculate_running=False
# ---------------------------------------------------------------------------
def quant_measure(x, *, num_bits=8, min_value=0.0, scale=1.0,
                  stochastic=0.5, training=True, seed=0):
    # TODO(synk): calculate_running=True branch (torch.kthvalue percentile +
    # running_max buffer update) is stateful and not implemented here.
    orig_shape = x.shape
    orig_dtype = x.dtype
    stoch = float(stochastic) if training else 0.0
    qmax = float(2.0 ** int(num_bits) - 1.0)
    min_value = float(min_value)

    n = int(x.size)
    if n == 0:
        return x

    # scalar prep (max reduction + scale math) in plain XLA — runs at HBM roofline
    max_v = jnp.max(x).astype(jnp.float32)
    max_v = jnp.where(max_v > 1.0, max_v * jnp.float32(scale), max_v)
    step = jnp.maximum((max_v - min_value) / qmax, 1e-6)
    params = jnp.stack([step, 1.0 / step]).astype(jnp.float32)     # (2,) SMEM scalars
    seed_arr = jnp.array([seed], dtype=jnp.int32)

    # lane-dense 2D slab in the ORIGINAL dtype (no wrapper-side f32 copy)
    flat = x.reshape(-1)
    pad = (-n) % _LANES
    if pad:
        flat = jnp.pad(flat, (0, pad))      # only the ragged case pays a copy; pad
    rows = flat.shape[0] // _LANES          # values are trimmed and never affect max
    x2d = flat.reshape(rows, _LANES)

    block_rows = rows if rows < _BLOCK_ROWS else _BLOCK_ROWS
    grid = (pl.cdiv(rows, block_rows),)

    kernel = functools.partial(
        _quant_kernel,
        qmax=qmax, min_value=min_value, stochastic=stoch,
        lanes=_LANES, block_rows=block_rows)

    out2d = pl.pallas_call(
        kernel,
        out_shape=jax.ShapeDtypeStruct((rows, _LANES), orig_dtype),
        grid=grid,
        in_specs=[
            pl.BlockSpec((2,), lambda i: (0,),
                         memory_space=pltpu.MemorySpace.SMEM),
            pl.BlockSpec((1,), lambda i: (0,),
                         memory_space=pltpu.MemorySpace.SMEM),
            pl.BlockSpec((block_rows, _LANES), lambda i: (i, 0)),
        ],
        out_specs=pl.BlockSpec((block_rows, _LANES), lambda i: (i, 0)),
        compiler_params=pltpu.CompilerParams(
            dimension_semantics=("parallel",)),
    )(params, seed_arr, x2d)

    out = out2d.reshape(-1)
    if pad:
        out = out[:n]
    return out.reshape(orig_shape)


# ---------------------------------------------------------------------------
# Pure-JAX reference (deterministic path, stoch = 0) for correctness checking.
# Uses the same reciprocal-multiply form as the kernel (<=1 ulp vs torch's div).
# ---------------------------------------------------------------------------
def _ref_quant(x, num_bits=8, min_value=0.0, scale_mult=1.0):
    max_v = jnp.max(x).astype(jnp.float32)
    max_v = jnp.where(max_v > 1.0, max_v * scale_mult, max_v)
    qmax = 2.0 ** num_bits - 1.0
    s = jnp.maximum((max_v - min_value) / qmax, 1e-6)
    out = (x.astype(jnp.float32) - min_value) * (1.0 / s)
    out = jnp.round(jnp.clip(out, 0.0, qmax))
    return (out * s + min_value).astype(x.dtype)


if __name__ == "__main__":
    key = jax.random.PRNGKey(0)
    # NCHW input, as a conv activation would be in PyTorch
    x = jax.random.uniform(key, (2, 4, 16, 16), dtype=jnp.float32,
                           minval=0.0, maxval=3.0)

    # eval path (stoch = 0): deterministic, compare against plain-JAX reference
    y_eval = quant_measure(x, training=False)
    jax.block_until_ready(y_eval)
    y_ref = _ref_quant(x)
    assert y_eval.shape == x.shape and y_eval.dtype == x.dtype
    assert jnp.allclose(y_eval, y_ref, atol=1e-5, rtol=1e-5), "mismatch vs reference"

    # training path (stoch = 0.5): stochastic rounding noise from the in-kernel
    # hash PRNG (deterministic per seed; not bit-identical to torch's RNG).
    y_train = quant_measure(x, training=True, stochastic=0.5, seed=1234)
    jax.block_until_ready(y_train)
    max_v = float(jnp.max(x))
    step = max_v / 255.0
    q = y_train / step
    assert float(jnp.min(y_train)) >= 0.0
    assert float(jnp.max(y_train)) <= max_v + 1e-5
    assert float(jnp.max(jnp.abs(q - jnp.round(q)))) < 1e-3   # stays on the quant grid
    assert bool(jnp.any(y_train != y_eval))                   # noise actually applied

    print("KERNEL_OK")
</pallas_src>

<mosaic_0001>
module attributes {stable_mosaic.version = 11 : i64} {
  func.func @_quant_kernel(%arg0: i32, %arg1: memref<2xf32, #tpu.memory_space<smem>>, %arg2: memref<1xi32, #tpu.memory_space<smem>>, %arg3: memref<2x1024xf32, #tpu.memory_space<vmem>>, %arg4: memref<2x1024xf32, #tpu.memory_space<vmem>>) attributes {dimension_semantics = [#tpu.dimension_semantics<parallel>], iteration_bounds = array<i64: 1>, scalar_prefetch = 0 : i64, scratch_operands = 0 : i64, tpu.core_type = #tpu.core_type<tc>, window_params = [{transform_indices = @transform_0, window_bounds = array<i64: 2>}, {transform_indices = @transform_1, window_bounds = array<i64: 1>}, {transform_indices = @transform_2, window_bounds = array<i64: 2, 1024>}, {transform_indices = @transform_3, window_bounds = array<i64: 2, 1024>}]} {
    %c0 = arith.constant 0 : index
    %0 = memref.load %arg1[%c0] : memref<2xf32, #tpu.memory_space<smem>>
    %c1 = arith.constant 1 : index
    %1 = memref.load %arg1[%c1] : memref<2xf32, #tpu.memory_space<smem>>
    %c0_0 = arith.constant 0 : index
    %c0_1 = arith.constant 0 : index
    %2 = vector.load %arg3[%c0_0, %c0_1] : memref<2x1024xf32, #tpu.memory_space<vmem>>, vector<2x1024xf32>
    %cst = arith.constant 0.000000e+00 : f32
    %3 = vector.broadcast %cst : f32 to vector<2x1024xf32>
    %4 = arith.subf %2, %3 : vector<2x1024xf32>
    %5 = vector.broadcast %1 : f32 to vector<2x1024xf32>
    %6 = arith.mulf %4, %5 : vector<2x1024xf32>
    %cst_2 = arith.constant 0.000000e+00 : f32
    %cst_3 = arith.constant 2.550000e+02 : f32
    %7 = vector.broadcast %cst_2 : f32 to vector<2x1024xf32>
    %8 = arith.maximumf %7, %6 : vector<2x1024xf32>
    %9 = vector.broadcast %cst_3 : f32 to vector<2x1024xf32>
    %10 = arith.minimumf %9, %8 : vector<2x1024xf32>
    %11 = math.roundeven %10 : vector<2x1024xf32>
    %12 = vector.broadcast %0 : f32 to vector<2x1024xf32>
    %13 = arith.mulf %11, %12 : vector<2x1024xf32>
    %cst_4 = arith.constant 0.000000e+00 : f32
    %14 = vector.broadcast %cst_4 : f32 to vector<2x1024xf32>
    %15 = arith.addf %13, %14 : vector<2x1024xf32>
    %c0_5 = arith.constant 0 : index
    %c0_6 = arith.constant 0 : index
    %16 = vector.load %arg4[%c0_5, %c0_6] : memref<2x1024xf32, #tpu.memory_space<vmem>>, vector<2x1024xf32>
    tpu.vector_store %arg4[%c0_5, %c0_6], %15 {strides = array<i32>} : memref<2x1024xf32, #tpu.memory_space<vmem>>, vector<2x1024xf32>,
    return
  }
  func.func @transform_0(%arg0: i32) -> i32 {
    %c0_i32 = arith.constant 0 : i32
    %c0_i32_0 = arith.constant 0 : i32
    return %c0_i32 : i32
  }
  func.func @transform_1(%arg0: i32) -> i32 {
    %c0_i32 = arith.constant 0 : i32
    %c0_i32_0 = arith.constant 0 : i32
    return %c0_i32 : i32
  }
  func.func @transform_2(%arg0: i32) -> (i32, i32) {
    %c0_i32 = arith.constant 0 : i32
    %c0_i32_0 = arith.constant 0 : i32
    return %arg0, %c0_i32 : i32, i32
  }
  func.func @transform_3(%arg0: i32) -> (i32, i32) {
    %c0_i32 = arith.constant 0 : i32
    %c0_i32_0 = arith.constant 0 : i32
    return %arg0, %c0_i32 : i32, i32
  }
}

</mosaic_0001>

<bundles_post_ra>
// kernel: tpu_custom_call.1
= control target key start
LH: loop header
LB: loop body
LE: loop exit
PB: predicated region body
PF: predicated region fallthrough
CT: control target
= control target key end

     0   :  { %9 = vsyncpa [#allocation6], 0  ;;  %s187_s0 = inlined_call_operand.vmem [shape: f32[2], index: 0, kind: input, shape index: {}]   ;;  %s188_s1 = inlined_call_operand.<no memory space> [shape: s32[1], index: 1, kind: input, shape index: {}]   ;;  %s189_s2 = inlined_call_operand.hbm [shape: f32[2,1024], index: 2, kind: input, shape index: {}]   ;;  %s190_s3 = inlined_call_operand.hbm [shape: f32[2,1024], index: 3, kind: output, shape index: {}]  }
   0x1   :  { %10 = vsyncpa [#allocation4], 0 }
   0x2   :  { %11 = vsyncpa [#allocation5], 0  ;;  %s18_s14 = sshll.u32 %s187_s0, 4  ;;  %s19_s14 = int_to_ptr.vmem [resolvable:$true] %s18_s14 }
   0x3   :  { %s97_s15 = scalar_lea.vmem %s19_s14, 16  ;;  %p102_p1 = scmp.lt.s32.totalorder %s19_s14, %s19_s14 }
   0x4   :  { %p98_p0 = scmp.ne.s32.totalorder %s19_s14, %s97_s15  ;;  %p103_p2 = scmp.lt.s32.totalorder %s97_s15, %s97_s15 }
   0x6   :  { %p104_p3 = por %p103_p2, %p102_p1 }
   0x8   :  { %p105_p4 = pnand %p104_p3, %p98_p0 }
   0xa   :  { %108 = shalt.err (!%p105_p4)
}
   0xb   :  { %s155_s1 = smov [#allocation3]   ;;  %s156_s16 = smov [#allocation7]  }
   0xc   :  { %21 = dma.vmem_to_smem %s19_s14, 16, %s155_s1, [#allocation6]  }
   0xd   :  { %s30_s17 = sshll.u32 %s156_s16, 4  ;;  %s31_s17 = int_to_ptr.vmem [resolvable:$true] %s30_s17 }
   0xe   :  { %s117_s18 = scalar_lea.vmem %s31_s17, 256  ;;  %p122_p6 = scmp.lt.s32.totalorder %s31_s17, %s31_s17 }
   0xf   :  { %p118_p5 = scmp.ne.s32.totalorder %s31_s17, %s117_s18  ;;  %p123_p7 = scmp.lt.s32.totalorder %s117_s18, %s117_s18 }
  0x11   :  { %p124_p8 = por %p123_p7, %p122_p6 }
  0x13   :  { %p125_p9 = pnand %p124_p8, %p118_p5 }
  0x15   :  { %128 = shalt.err (!%p125_p9)
}
  0x16   :  { %33 = dma.hbm_to_vmem [thread:$0]  %s189_s2, 256, %s31_s17, [#allocation4]  }
  0x17   :  { %149 = dma.done.wait [#allocation6], 16  }
  0x18   :  { %150 = vsyncadd [#allocation6], 4294967280 }
  0x19   :  { %151 = dma.done.wait [#allocation4], 256  }
  0x1a   :  { %152 = vsyncadd [#allocation4], 4294967040 }
  0x1b   :  { %40 = sfence }
  0x1c   :  { %s77_s20 = sld [smem:[#allocation3 + $0x1]]  ;;  %v43_v0 = vld [vmem:[#allocation7] sm:$0xff]  ;;  %v44_v1 = vld [vmem:[#allocation7 + $0x8] sm:$0xff]  ;;  %s157_s2 = smov [#allocation8]  }
  0x1d   :  { %s41_s21 = sld [smem:[#allocation3]]  ;;  %s67_s22 = sshll.u32 %s157_s2, 4  ;;  %s68_s22 = int_to_ptr.vmem [resolvable:$true] %s67_s22 }
  0x1e   :  { %s129_s23 = scalar_lea.vmem %s68_s22, 256  ;;  %p134_p11 = scmp.lt.s32.totalorder %s68_s22, %s68_s22 }
  0x1f   :  { %p130_p10 = scmp.ne.s32.totalorder %s68_s22, %s129_s23  ;;  %p135_p12 = scmp.lt.s32.totalorder %s129_s23, %s129_s23 }
  0x21   :  { %p136_p13 = por %p135_p12, %p134_p11 }
  0x22   :  { %v45_v2 = vstv %s77_s20 }
  0x23   :  { %v46_v3 = vmul.f32 %v45_v2, %v43_v0  ;;  %v47_v4 = vmul.f32 %v45_v2, %v44_v1  ;;  %v54_v20 = vstv %s41_s21  ;;  %p137_p0 = pnand %p136_p13, %p130_p10 }
  0x25   :  { %v48_v5 = vmax.f32 %v46_v3, 0.0  ;;  %v49_v6 = vmax.f32 %v47_v4, 0.0 }
  0x27   :  { %v50_v7 = vmin.f32 %v48_v5, 255.0  ;;  %v51_v8 = vmin.f32 %v49_v6, 255.0 }
  0x29   :  { %v80_v9 = vcvt.f32.s32 %v50_v7  ;;  %v78_v10 = vand.u32 2147483647, %v50_v7  ;;  %v88_v11 = vcvt.f32.s32 %v51_v8  ;;  %v83_v13 = vand.u32 2147483648, %v50_v7 }
  0x2a   :  { %v86_v14 = vand.u32 2147483647, %v51_v8  ;;  %v91_v16 = vand.u32 2147483648, %v51_v8 }
  0x2b   :  { %v81_v12 = vcvt.s32.f32 %v80_v9  ;;  %v89_v15 = vcvt.s32.f32 %v88_v11  ;;  %vm79_vm0 = vcmp.lt.f32.partialorder %v78_v10, 8388608.0 }
  0x2c   :  { %vm87_vm1 = vcmp.lt.f32.partialorder %v86_v14, 8388608.0 }
  0x2d   :  { %v82_v17 = vand.u32 2147483647, %v81_v12  ;;  %v90_v18 = vand.u32 2147483647, %v89_v15 }
  0x2f   :  { %v84_v19 = vor.u32 %v83_v13, %v82_v17  ;;  %v92_v21 = vor.u32 %v91_v16, %v90_v18 }
  0x31   :  { %v85_v22 = vsel %vm79_vm0, %v84_v19, %v50_v7  ;;  %v93_v24 = vsel %vm87_vm1, %v92_v21, %v51_v8 }
  0x32   :  { %v55_v23 = vmul.f32 %v85_v22, %v54_v20  ;;  %v56_v25 = vmul.f32 %v93_v24, %v54_v20 }
  0x34   :  { %59 = vst [vmem:[#allocation8] sm:$0xff] %v55_v23  ;;  %60 = vst [vmem:[#allocation8 + $0x8] sm:$0xff] %v56_v25 }
  0x35   :  { %140 = shalt.err (!%p137_p0)
}
  0x36   :  { %70 = dma.vmem_to_hbm [thread:$0]  %s68_s22, 256, %s190_s3, [#allocation5]  }
  0x37   :  { %153 = dma.done.wait [#allocation5], 256  }
  0x38   :  { %154 = vsyncadd [#allocation5], 4294967040 }
  0x39   :  { %74 = vsyncpa [#allocation4], 1 }
  0x3a   :  { %75 = vsyncpa [#allocation5], 1 }
  0x3b   :  { %76 = vsyncpa [#allocation6], 1 }

</bundles_post_ra>
